<compile_context>
chip_gen: v7x
topology: tpu7x:2x2x1
jax: 0.10.0
libtpu: 0.0.40
codegen_flags: <defaults>
</compile_context>

<pallas_src>
import jax
import jax.numpy as jnp
from jax.experimental import pallas as pl
from jax.experimental.pallas import tpu as pltpu


def _affine_kernel(x_ref, w_ref, b_ref, out_ref):
    # Single fused affine: (TILE_B, 21) @ (21, 2) + (1, 2)
    out_ref[...] = (
        jnp.dot(x_ref[...], w_ref[...], preferred_element_type=jnp.float32)
        + b_ref[...]
    ).astype(out_ref.dtype)


def _fuse_params(params):
    """Collapse the 4 affine layers into one (exact: no nonlinearity between
    layers in the reference forward)."""
    w1, b1 = params["w1"], params["b1"]
    w2, b2 = params["w2"], params["b2"]
    w3, b3 = params["w3"], params["b3"]
    w4, b4 = params["w4"], params["b4"]
    w_eff = w1 @ w2 @ w3 @ w4                                   # (21, 2)
    b_eff = ((b1 @ w2 + b2) @ w3 + b3) @ w4 + b4                # (1, 2)
    return w_eff, b_eff


def net_emb_forward(x, params, tile_b=8192):
    """x: (B, 21) float32. params: dict of (in,out) weights and (1,out) biases."""
    B, F = x.shape
    w_eff, b_eff = _fuse_params(params)
    out_dim = w_eff.shape[1]

    # For small batches use the full batch as one block (block dim == full
    # array dim -> no (8,128) divisibility requirement, no padding). For large
    # batches keep tile_b (multiple of 8); the ragged last block is handled by
    # Pallas, so no wrapper-side jnp.pad (which would be an extra HBM pass).
    if B <= tile_b:
        tile_b = B
    grid = (pl.cdiv(B, tile_b),)

    cost = pl.CostEstimate(
        flops=2 * B * F * out_dim,
        transcendentals=0,
        bytes_accessed=B * (F + out_dim) * 4 + (F * out_dim + out_dim) * 4,
    )

    out = pl.pallas_call(
        _affine_kernel,
        out_shape=jax.ShapeDtypeStruct((B, out_dim), jnp.float32),
        grid=grid,
        in_specs=[
            # x streams through VMEM, double-buffered along the batch grid.
            pl.BlockSpec((tile_b, F), lambda i: (i, 0),
                         memory_space=pltpu.VMEM),
            # Fused weight / bias stay VMEM-resident (constant index_map).
            pl.BlockSpec(w_eff.shape, lambda i: (0, 0),
                         memory_space=pltpu.VMEM),
            pl.BlockSpec(b_eff.shape, lambda i: (0, 0),
                         memory_space=pltpu.VMEM),
        ],
        out_specs=pl.BlockSpec((tile_b, out_dim), lambda i: (i, 0),
                               memory_space=pltpu.VMEM),
        compiler_params=pltpu.CompilerParams(
            dimension_semantics=("parallel",),
            # Lane-padded tiles cost ~2 KiB/row double-buffered; 48 MiB lets
            # tile_b=8192 fit on all of v5e/v6e/v7x with headroom.
            vmem_limit_bytes=48 * 1024 * 1024,
        ),
        cost_estimate=cost,
    )(x, w_eff, b_eff)

    return out


def init_params(key):
    """Deterministic synthetic parameters matching Net_emb.__init__ shapes.

    PyTorch nn.Linear(in, out) has weight (out, in), bias (out,). We store the
    weight transposed as (in, out) and the bias as (1, out)."""
    dims = [(21, 32), (32, 64), (64, 32), (32, 2)]
    params = {}
    for i, (fan_in, fan_out) in enumerate(dims, start=1):
        key, kw, kb = jax.random.split(key, 3)
        bound = 1.0 / jnp.sqrt(fan_in)
        params[f"w{i}"] = jax.random.uniform(
            kw, (fan_in, fan_out), jnp.float32, -bound, bound)
        params[f"b{i}"] = jax.random.uniform(
            kb, (1, fan_out), jnp.float32, -bound, bound)
    return params


def _reference(x, params):
    # Un-fused 4-layer chain (matches the PyTorch forward exactly).
    h = x @ params["w1"] + params["b1"]
    h = h @ params["w2"] + params["b2"]
    h = h @ params["w3"] + params["b3"]
    return h @ params["w4"] + params["b4"]


if __name__ == "__main__":
    key = jax.random.PRNGKey(0)
    key, kx = jax.random.split(key)

    B = 8                        # small smoke-test batch
    x = jax.random.normal(kx, (B, 21), jnp.float32)   # 21 input features

    params = init_params(key)

    out = net_emb_forward(x, params)
    out = jax.block_until_ready(out)

    ref = _reference(x, params)
    assert out.shape == (B, 2), out.shape
    # Fusion changes float summation order slightly; still f32-tight.
    assert jnp.allclose(out, ref, atol=1e-4, rtol=1e-4), "mismatch vs JAX reference"

    print("KERNEL_OK")
</pallas_src>

<mosaic_0001>
module attributes {stable_mosaic.version = 11 : i64} {
  func.func @_affine_kernel(%arg0: i32, %arg1: memref<8x21xf32, #tpu.memory_space<vmem>>, %arg2: memref<21x2xf32, #tpu.memory_space<vmem>>, %arg3: memref<1x2xf32, #tpu.memory_space<vmem>>, %arg4: memref<8x2xf32, #tpu.memory_space<vmem>>) attributes {dimension_semantics = [#tpu.dimension_semantics<parallel>], iteration_bounds = array<i64: 1>, scalar_prefetch = 0 : i64, scratch_operands = 0 : i64, tpu.core_type = #tpu.core_type<tc>, window_params = [{transform_indices = @transform_0, window_bounds = array<i64: 8, 21>}, {pipeline_mode = #tpu.pipeline_mode<synchronous>, transform_indices = @transform_1, window_bounds = array<i64: 21, 2>}, {pipeline_mode = #tpu.pipeline_mode<synchronous>, transform_indices = @transform_2, window_bounds = array<i64: 1, 2>}, {transform_indices = @transform_3, window_bounds = array<i64: 8, 2>}]} {
    %c0 = arith.constant 0 : index
    %c0_0 = arith.constant 0 : index
    %0 = vector.load %arg1[%c0, %c0_0] : memref<8x21xf32, #tpu.memory_space<vmem>>, vector<8x21xf32>
    %c0_1 = arith.constant 0 : index
    %c0_2 = arith.constant 0 : index
    %1 = vector.load %arg2[%c0_1, %c0_2] : memref<21x2xf32, #tpu.memory_space<vmem>>, vector<21x2xf32>
    %cst = arith.constant dense<0.000000e+00> : vector<8x2xf32>
    %2 = tpu.matmul %0, %1, %cst {dimension_numbers = #tpu.dot_dimension_numbers<[1], [0], [0], [1], [0, 0, 1, 1], [], []>} : vector<8x21xf32>, vector<21x2xf32>, vector<8x2xf32> -> vector<8x2xf32>
    %c0_3 = arith.constant 0 : index
    %c0_4 = arith.constant 0 : index
    %3 = vector.load %arg3[%c0_3, %c0_4] : memref<1x2xf32, #tpu.memory_space<vmem>>, vector<1x2xf32>
    %4 = vector.broadcast %3 : vector<1x2xf32> to vector<8x2xf32>
    %5 = arith.addf %2, %4 : vector<8x2xf32>
    %c0_5 = arith.constant 0 : index
    %c0_6 = arith.constant 0 : index
    %6 = vector.load %arg4[%c0_5, %c0_6] : memref<8x2xf32, #tpu.memory_space<vmem>>, vector<8x2xf32>
    tpu.vector_store %arg4[%c0_5, %c0_6], %5 {strides = array<i32>} : memref<8x2xf32, #tpu.memory_space<vmem>>, vector<8x2xf32>,
    return
  }
  func.func @transform_0(%arg0: i32) -> (i32, i32) {
    %c0_i32 = arith.constant 0 : i32
    %c0_i32_0 = arith.constant 0 : i32
    return %arg0, %c0_i32 : i32, i32
  }
  func.func @transform_1(%arg0: i32) -> (i32, i32) {
    %c0_i32 = arith.constant 0 : i32
    %c0_i32_0 = arith.constant 0 : i32
    %c0_i32_1 = arith.constant 0 : i32
    return %c0_i32, %c0_i32_0 : i32, i32
  }
  func.func @transform_2(%arg0: i32) -> (i32, i32) {
    %c0_i32 = arith.constant 0 : i32
    %c0_i32_0 = arith.constant 0 : i32
    %c0_i32_1 = arith.constant 0 : i32
    return %c0_i32, %c0_i32_0 : i32, i32
  }
  func.func @transform_3(%arg0: i32) -> (i32, i32) {
    %c0_i32 = arith.constant 0 : i32
    %c0_i32_0 = arith.constant 0 : i32
    return %arg0, %c0_i32 : i32, i32
  }
}

</mosaic_0001>

<bundles_post_ra>
// kernel: tpu_custom_call.1
= control target key start
LH: loop header
LB: loop body
LE: loop exit
PB: predicated region body
PF: predicated region fallthrough
CT: control target
= control target key end

     0   :  { %v131_v0 = vmov 0.0|0.0   ;;  %vm132_vm0 = vmmov 0   ;;  %v133_v3 = vmov 0.0   ;;  %vm29_vm1 = vcmask 1044480   ;;  %s172_s1 = inlined_call_operand.vmem [shape: f32[21,2], index: 1, kind: input, shape index: {}]   ;;  %s173_s0 = inlined_call_operand.vmem [shape: f32[8,21], index: 0, kind: input, shape index: {}]   ;;  %s174_s2 = inlined_call_operand.vmem [shape: f32[1,2], index: 2, kind: input, shape index: {}]   ;;  %s175_s3 = inlined_call_operand.vmem [shape: f32[8,2], index: 3, kind: output, shape index: {}]  }
   0x1   :  { %125 = vmatprep.subr.bf16.mxu0 %v131_v0  ;;  %v15_v1 = vld [vmem:[%s172_s1] sm:$0xff]  ;;  %v16_v2 = vld [vmem:[%s172_s1 + $0x8] sm:$0xff]  ;;  %122 = vmatprep.mubr.msk.f32.mxu0 %vm132_vm0, %v133_v3  ;;  %v17_v5 = vld [vmem:[%s172_s1 + $0x10] sm:$0x1f]  ;;  %vm25_vm2 = vcmask 171008   ;;  %vm103_vm3 = vcmask 15360  }
   0x2   :  { %v126_v4 = vpack.c.bf16 %v16_v2, %v15_v1  ;;  %v14_v6 = vld [vmem:[%s173_s0] sm:$0xff] }
   0x3   :  { %v109_v7 = vld [vmem:[%s174_s2] ss:$0 sm:$0xff] }
   0x4   :  { %127 = vmatpush3.bf16.msra.mxu0 %v126_v4 }
   0x5   :  { %120 = vmatprep.subr.mxu0 %v133_v3 }
   0x8   :  { %121 = vmatpush3.msk.msra.mxu0 %vm29_vm1, %v17_v5 }
   0x9   :  { %123 = vmatmul.mubr.msk.f32.vlgmr.msra.gmra.mrb[0].mxu0 %vm25_vm2, %v14_v6 }
  0xdc   :  { %v99_v8 = vpop.f32.mrb[0].mxu0 }
  0xdd   :  { %v100_v9 = vadd.f32 %v109_v7, %v99_v8  ;;  %v124_v10 = vpop.f32.mrb[1].mxu0 }
  0xdf   :  { %104 = vst.msk [vmem:[%s175_s3] sm:$0xff] %vm103_vm3, %v100_v9 }

</bundles_post_ra>
